<compile_context>
chip_gen: v7x
topology: tpu7x:2x2x1
jax: 0.10.0
libtpu: 0.0.40
codegen_flags: <defaults>
</compile_context>

<pallas_src>
import jax
import jax.numpy as jnp
from jax.experimental import pallas as pl
from jax.experimental.pallas import tpu as pltpu
import numpy as np

ACT_ALPHA = 0.2  # LeakyReLU slope for layers with activation

# Static layer structure: (name, kernel_size, apply_activation)
LAYERS = [
    ("fr", 1, True),    # encoder.from_rgb : ch_rgb_in -> ch_in
    ("e1", 3, True),    # encoder conv 1   : ch_in     -> hid_e
    ("e2", 3, True),    # encoder conv 2   : hid_e     -> enc_out
    ("er", 1, False),   # encoder residual : ch_in     -> enc_out
    ("d0", 3, True),    # decoder conv 0   : enc_out   -> hid_d
    ("d1", 3, True),    # decoder conv 1   : hid_d     -> ch_out
    ("dr", 1, False),   # decoder residual : enc_out   -> ch_out
    ("tr", 1, False),   # decoder.to_rgb   : ch_out    -> ch_rgb_out
]

# Which layer keeps the constant-ones bias channel alive in its output.  Each
# activation has exactly one propagating producer (the residual branch of each
# sum does not propagate), so the channel stays exactly 1.0 everywhere.
PROPAGATE_ONES = {"fr": True, "e1": True, "e2": True, "er": False,
                  "d0": True, "d1": True, "dr": False, "tr": False}


def _pad8(n):
    """Pad a channel count up to the f32 sublane granule (>= 8, multiple of 8)."""
    return max(8, ((n + 7) // 8) * 8)


def _leaky(x, alpha=ACT_ALPHA):
    return jnp.where(x >= 0, x, alpha * x)


def _two_tensorcore_chip():
    """True on chips where a 'parallel' grid axis is sharded across 2 TCs."""
    try:
        kind = jax.devices()[0].device_kind.lower()
    except Exception:
        return False
    return any(tag in kind for tag in ("v4", "v5p", "v7"))


def _make_kernel(metas, seg_len, c_rgb_in, c_rgb_out):
    """metas: list of (row_offset, cout_pad, cin_pad, K, act) per layer.
    seg_len: per-batch time length (batch is folded into the lane axis)."""
    max_ci3 = max([ci_p for (_, _, ci_p, K, _) in metas if K == 3], default=8)

    def kernel(rgb_ref, slab_ref, out_ref):
        f32 = jnp.float32
        tb = rgb_ref.shape[-1]           # lanes in this block (= NB * seg_len)

        # Hoisted per-batch-segment boundary masks for the K=3 shifted copies.
        col = jax.lax.broadcasted_iota(jnp.int32, (1, tb), 1)
        has_prev = jnp.broadcast_to((col % seg_len != 0).astype(f32),
                                    (max_ci3, tb))
        has_next = jnp.broadcast_to((col % seg_len != seg_len - 1).astype(f32),
                                    (max_ci3, tb))

        def stack3(x):
            # Build the (3*ci_p, tb) im2col RHS with XLU rolls + boundary masks.
            ci_p = x.shape[0]
            x_prev = pltpu.roll(x, 1, axis=1) * has_prev[:ci_p]        # x[:, t-1]
            x_next = pltpu.roll(x, tb - 1, axis=1) * has_next[:ci_p]   # x[:, t+1]
            return jnp.concatenate([x_prev, x, x_next], axis=0)

        def conv(idx, x):
            row, co_p, ci_p, K, act = metas[idx]
            w = slab_ref[pl.ds(row, co_p), pl.ds(0, K * ci_p)]   # (co_p, K*ci_p)
            rhs = x if K == 1 else stack3(x)
            y = jnp.dot(w, rhs, preferred_element_type=f32)      # bias folded in
            return _leaky(y) if act else y

        # First-layer input: raw rgb rows + constant-ones bias channel + zeros,
        # zero-extended in-kernel (no wrapper pad op).
        ci_p0 = metas[0][2]
        tail_rows = ci_p0 - c_rgb_in
        tail_ix = jax.lax.broadcasted_iota(jnp.int32, (tail_rows, tb), 0)
        tail = (tail_ix == 0).astype(f32)                 # row 0 = ones channel
        x = jnp.concatenate([rgb_ref[...].astype(f32), tail], axis=0)

        e_in = conv(0, x)                    # from_rgb
        h = conv(1, e_in)                    # encoder DBlock
        h = conv(2, h)
        enc = h + conv(3, e_in)              # encoder residual
        h = conv(4, enc)                     # decoder GBlock
        h = conv(5, h)
        dec = h + conv(6, enc)               # decoder residual
        y = conv(7, dec)                     # to_rgb (pggan, no tanh)
        out_ref[...] = y[:c_rgb_out, :].astype(out_ref.dtype)

    return kernel


def unet_block_forward(rgb_in, params):
    """rgb_in: (N, C_rgb_in, T) float32.  params: dict name -> (w, b),
    w: (Cout, Cin, K), b: (Cout,).  Returns (N, C_rgb_out, T) float32."""
    N, C_rgb_in, T = rgb_in.shape
    C_rgb_out = params["tr"][0].shape[0]

    # ---- host-side packing: one zero-padded weight slab, bias folded in -----
    metas, rows_specs = [], []
    row, w_cols = 0, 0
    for name, K, act in LAYERS:
        w, _ = params[name]
        co, ci, k = w.shape
        assert k == K
        co_p, ci_p = _pad8(co + 1), _pad8(ci + 1)   # +1: constant-ones channel
        metas.append((row, co_p, ci_p, K, act))
        rows_specs.append((name, K, row, co, ci, co_p, ci_p))
        w_cols = max(w_cols, K * ci_p)
        row += co_p
    total_rows = row

    slab = np.zeros((total_rows, w_cols), np.float32)
    for name, K, r0, co, ci, co_p, ci_p in rows_specs:
        w, b = params[name]
        w_np = np.asarray(w, np.float32)
        for k in range(K):
            slab[r0:r0 + co, k * ci_p:k * ci_p + ci] = w_np[:, :, k]
        # Bias goes in the center-tap column of the input's ones channel.
        ones_col = ((K - 1) // 2) * ci_p + ci
        slab[r0:r0 + co, ones_col] = np.asarray(b, np.float32)
        if PROPAGATE_ONES[name]:
            slab[r0 + co, ones_col] = 1.0   # keep the ones channel alive
    slab = jnp.asarray(slab)

    # ---- fold batch into the lane (time) axis (host reshape, per review) ----
    NT = N * T
    x2d = jnp.transpose(rgb_in.astype(jnp.float32), (1, 0, 2)).reshape(C_rgb_in, NT)

    # grid: 1 step on single-TC chips (v5e/v6e); 2 parallel steps on 2-TC chips.
    G = 1
    if _two_tensorcore_chip() and N % 2 == 0 and ((N // 2) * T) % 128 == 0:
        G = 2
    TB = NT // G

    kernel = _make_kernel(metas, T, C_rgb_in, C_rgb_out)

    # VMEM limit derived from actual tile sizes (activations + slab + I/O
    # blocks) with generous headroom; floored at 8 MiB, capped at 32 MiB.
    live_rows = 4 * total_rows            # loose bound on live activation rows
    est = 4 * TB * (live_rows + 4 * (C_rgb_in + C_rgb_out)) + 16 * slab.size
    vmem_limit = int(min(max(4 * est, 8 << 20), 32 << 20))

    out2d = pl.pallas_call(
        kernel,
        out_shape=jax.ShapeDtypeStruct((C_rgb_out, NT), jnp.float32),
        grid=(G,),
        in_specs=[
            pl.BlockSpec((C_rgb_in, TB), lambda g: (0, g)),
            pl.BlockSpec(slab.shape, lambda g: (0, 0)),   # single param slab
        ],
        out_specs=pl.BlockSpec((C_rgb_out, TB), lambda g: (0, g)),
        compiler_params=pltpu.CompilerParams(
            dimension_semantics=("parallel",),
            vmem_limit_bytes=vmem_limit),
    )(x2d, slab)

    # Unfold lanes back to (N, C_rgb_out, T).
    return out2d.reshape(C_rgb_out, N, T).transpose(1, 0, 2)


# ------------------------- pure-JAX reference --------------------------------

def _ref_conv1d(x, w, b, act):
    K = w.shape[-1]
    pad = (K - 1) // 2
    y = jax.lax.conv_general_dilated(
        x, w, window_strides=(1,), padding=[(pad, pad)],
        dimension_numbers=("NCH", "OIH", "NCH"))
    y = y + b[None, :, None]
    return _leaky(y) if act else y


def ref_forward(rgb, P):
    acts = dict((n, a) for n, _, a in LAYERS)
    e_in = _ref_conv1d(rgb, *P["fr"], acts["fr"])
    h = _ref_conv1d(e_in, *P["e1"], acts["e1"])
    h = _ref_conv1d(h, *P["e2"], acts["e2"])
    enc = h + _ref_conv1d(e_in, *P["er"], acts["er"])
    h = _ref_conv1d(enc, *P["d0"], acts["d0"])
    h = _ref_conv1d(h, *P["d1"], acts["d1"])
    dec = h + _ref_conv1d(enc, *P["dr"], acts["dr"])
    return _ref_conv1d(dec, *P["tr"], acts["tr"])


# ------------------------------- main -----------------------------------------

if __name__ == "__main__":
    # Module hyperparameters (small, consistent with UnetBlock.__init__).
    N, T = 4, 128                      # T multiple of 128 -> lane-dense blocks
    ch_in, ch_out = 4, 4
    ch_rgb_in, ch_rgb_out = 2, 2
    enc_out = ch_in + ch_out           # inner_layer is None -> enc_ch_out
    hid_e = max(ch_in, 4)              # DBlock hidden (not deep)
    hid_d = max(ch_out, 4)             # GBlock hidden (not deep)

    layer_dims = {                     # name -> (Cout, Cin, K)
        "fr": (ch_in, ch_rgb_in, 1),
        "e1": (hid_e, ch_in, 3),
        "e2": (enc_out, hid_e, 3),
        "er": (enc_out, ch_in, 1),
        "d0": (hid_d, enc_out, 3),
        "d1": (ch_out, hid_d, 3),
        "dr": (ch_out, enc_out, 1),
        "tr": (ch_rgb_out, ch_out, 1),
    }

    key = jax.random.PRNGKey(0)
    params = {}
    for name, (co, ci, k) in layer_dims.items():
        key, kw, kb = jax.random.split(key, 3)
        w = jax.random.normal(kw, (co, ci, k), jnp.float32) / np.sqrt(ci * k)
        b = 0.1 * jax.random.normal(kb, (co,), jnp.float32)
        params[name] = (w, b)

    key, kx = jax.random.split(key)
    rgb_in = jax.random.normal(kx, (N, ch_rgb_in, T), jnp.float32)

    out = jax.block_until_ready(unet_block_forward(rgb_in, params))
    ref = jax.block_until_ready(ref_forward(rgb_in, params))

    assert out.shape == (N, ch_rgb_out, T), out.shape
    np.testing.assert_allclose(np.asarray(out), np.asarray(ref),
                               rtol=2e-4, atol=2e-4)
    print("KERNEL_OK")
</pallas_src>

<mosaic_0001>
module attributes {stable_mosaic.version = 11 : i64} {
  func.func @kernel(%arg0: i32, %arg1: memref<2x512xf32, #tpu.memory_space<vmem>>, %arg2: memref<80x48xf32, #tpu.memory_space<vmem>>, %arg3: memref<2x512xf32, #tpu.memory_space<vmem>>) attributes {dimension_semantics = [#tpu.dimension_semantics<parallel>], iteration_bounds = array<i64: 1>, scalar_prefetch = 0 : i64, scratch_operands = 0 : i64, tpu.core_type = #tpu.core_type<tc>, window_params = [{transform_indices = @transform_0, window_bounds = array<i64: 2, 512>}, {pipeline_mode = #tpu.pipeline_mode<synchronous>, transform_indices = @transform_1, window_bounds = array<i64: 80, 48>}, {transform_indices = @transform_2, window_bounds = array<i64: 2, 512>}]} {
    %0 = tpu.iota {dimensions = array<i32: 1>} : vector<1x512xi32>
    %c128_i32 = arith.constant 128 : i32
    %c0_i32 = arith.constant 0 : i32
    %1 = arith.cmpi eq, %c128_i32, %c0_i32 : i32
    %c1_i32 = arith.constant 1 : i32
    %2 = arith.select %1, %c1_i32, %c128_i32 : i32
    %3 = vector.broadcast %2 : i32 to vector<1x512xi32>
    %4 = arith.remsi %0, %3 : vector<1x512xi32>
    %c0_i32_0 = arith.constant 0 : i32
    %5 = vector.broadcast %c0_i32_0 : i32 to vector<1x512xi32>
    %6 = arith.cmpi ne, %4, %5 : vector<1x512xi32>
    %c0_i32_1 = arith.constant 0 : i32
    %7 = vector.broadcast %c0_i32_1 : i32 to vector<1x512xi32>
    %8 = arith.cmpi slt, %4, %7 : vector<1x512xi32>
    %c0_i32_2 = arith.constant 0 : i32
    %9 = arith.cmpi slt, %2, %c0_i32_2 : i32
    %10 = vector.broadcast %9 : i1 to vector<1x512xi1>
    %11 = vector.broadcast %10 : vector<1x512xi1> to vector<1x512xi1>
    %12 = arith.xori %8, %11 : vector<1x512xi1>
    %13 = arith.andi %12, %6 : vector<1x512xi1>
    %14 = vector.broadcast %2 : i32 to vector<1x512xi32>
    %15 = arith.addi %4, %14 : vector<1x512xi32>
    %16 = arith.select %13, %15, %4 : vector<1x512xi1>, vector<1x512xi32>
    %c0_i32_3 = arith.constant 0 : i32
    %17 = vector.broadcast %c0_i32_3 : i32 to vector<1x512xi32>
    %18 = arith.cmpi ne, %16, %17 : vector<1x512xi32>
    %19 = arith.extui %18 : vector<1x512xi1> to vector<1x512xi32>
    %20 = arith.sitofp %19 : vector<1x512xi32> to vector<1x512xf32>
    %21 = vector.shape_cast %20 : vector<1x512xf32> to vector<1x512xf32>
    %22 = vector.broadcast %21 : vector<1x512xf32> to vector<16x512xf32>
    %c128_i32_4 = arith.constant 128 : i32
    %c0_i32_5 = arith.constant 0 : i32
    %23 = arith.cmpi eq, %c128_i32_4, %c0_i32_5 : i32
    %c1_i32_6 = arith.constant 1 : i32
    %24 = arith.select %23, %c1_i32_6, %c128_i32_4 : i32
    %25 = vector.broadcast %24 : i32 to vector<1x512xi32>
    %26 = arith.remsi %0, %25 : vector<1x512xi32>
    %c0_i32_7 = arith.constant 0 : i32
    %27 = vector.broadcast %c0_i32_7 : i32 to vector<1x512xi32>
    %28 = arith.cmpi ne, %26, %27 : vector<1x512xi32>
    %c0_i32_8 = arith.constant 0 : i32
    %29 = vector.broadcast %c0_i32_8 : i32 to vector<1x512xi32>
    %30 = arith.cmpi slt, %26, %29 : vector<1x512xi32>
    %c0_i32_9 = arith.constant 0 : i32
    %31 = arith.cmpi slt, %24, %c0_i32_9 : i32
    %32 = vector.broadcast %31 : i1 to vector<1x512xi1>
    %33 = vector.broadcast %32 : vector<1x512xi1> to vector<1x512xi1>
    %34 = arith.xori %30, %33 : vector<1x512xi1>
    %35 = arith.andi %34, %28 : vector<1x512xi1>
    %36 = vector.broadcast %24 : i32 to vector<1x512xi32>
    %37 = arith.addi %26, %36 : vector<1x512xi32>
    %38 = arith.select %35, %37, %26 : vector<1x512xi1>, vector<1x512xi32>
    %c127_i32 = arith.constant 127 : i32
    %39 = vector.broadcast %c127_i32 : i32 to vector<1x512xi32>
    %40 = arith.cmpi ne, %38, %39 : vector<1x512xi32>
    %41 = arith.extui %40 : vector<1x512xi1> to vector<1x512xi32>
    %42 = arith.sitofp %41 : vector<1x512xi32> to vector<1x512xf32>
    %43 = vector.shape_cast %42 : vector<1x512xf32> to vector<1x512xf32>
    %44 = vector.broadcast %43 : vector<1x512xf32> to vector<16x512xf32>
    %45 = tpu.iota {dimensions = array<i32: 0>} : vector<6x512xi32>
    %c0_i32_10 = arith.constant 0 : i32
    %46 = vector.broadcast %c0_i32_10 : i32 to vector<6x512xi32>
    %47 = arith.cmpi eq, %45, %46 : vector<6x512xi32>
    %48 = arith.extui %47 : vector<6x512xi1> to vector<6x512xi32>
    %49 = arith.sitofp %48 : vector<6x512xi32> to vector<6x512xf32>
    %c0 = arith.constant 0 : index
    %c0_11 = arith.constant 0 : index
    %50 = vector.load %arg1[%c0, %c0_11] : memref<2x512xf32, #tpu.memory_space<vmem>>, vector<2x512xf32>
    %51 = tpu.concatenate %50, %49 in 0 : vector<2x512xf32>, vector<6x512xf32> -> vector<8x512xf32>
    %c0_12 = arith.constant 0 : index
    %c0_13 = arith.constant 0 : index
    %52 = vector.load %arg2[%c0_12, %c0_13] : memref<80x48xf32, #tpu.memory_space<vmem>>, vector<8x8xf32>
    %cst = arith.constant dense<0.000000e+00> : vector<8x512xf32>
    %53 = tpu.matmul %52, %51, %cst {dimension_numbers = #tpu.dot_dimension_numbers<[1], [0], [0], [1], [0, 0, 1, 1], [], []>} : vector<8x8xf32>, vector<8x512xf32>, vector<8x512xf32> -> vector<8x512xf32>
    %cst_14 = arith.constant 0.000000e+00 : f32
    %54 = vector.broadcast %cst_14 : f32 to vector<8x512xf32>
    %55 = arith.cmpf oge, %53, %54 : vector<8x512xf32>
    %cst_15 = arith.constant 2.000000e-01 : f32
    %56 = vector.broadcast %cst_15 : f32 to vector<8x512xf32>
    %57 = arith.mulf %56, %53 : vector<8x512xf32>
    %58 = arith.select %55, %53, %57 : vector<8x512xi1>, vector<8x512xf32>
    %c8 = arith.constant 8 : index
    %c0_16 = arith.constant 0 : index
    %59 = vector.load %arg2[%c8, %c0_16] : memref<80x48xf32, #tpu.memory_space<vmem>>, vector<8x24xf32>
    %c1_i32_17 = arith.constant 1 : i32
    %60 = tpu.dynamic_rotate %58 by %c1_i32_17 dim 1 : vector<8x512xf32>, i32 -> vector<8x512xf32>
    %61 = vector.extract_strided_slice %22 {offsets = [0, 0], sizes = [8, 512], strides = [1, 1]} : vector<16x512xf32> to vector<8x512xf32>
    %62 = arith.mulf %60, %61 : vector<8x512xf32>
    %c511_i32 = arith.constant 511 : i32
    %63 = tpu.dynamic_rotate %58 by %c511_i32 dim 1 : vector<8x512xf32>, i32 -> vector<8x512xf32>
    %64 = vector.extract_strided_slice %44 {offsets = [0, 0], sizes = [8, 512], strides = [1, 1]} : vector<16x512xf32> to vector<8x512xf32>
    %65 = arith.mulf %63, %64 : vector<8x512xf32>
    %66 = tpu.concatenate %62, %58, %65 in 0 : vector<8x512xf32>, vector<8x512xf32>, vector<8x512xf32> -> vector<24x512xf32>
    %cst_18 = arith.constant dense<0.000000e+00> : vector<8x512xf32>
    %67 = tpu.matmul %59, %66, %cst_18 {dimension_numbers = #tpu.dot_dimension_numbers<[1], [0], [0], [1], [0, 0, 1, 1], [], []>} : vector<8x24xf32>, vector<24x512xf32>, vector<8x512xf32> -> vector<8x512xf32>
    %cst_19 = arith.constant 0.000000e+00 : f32
    %68 = vector.broadcast %cst_19 : f32 to vector<8x512xf32>
    %69 = arith.cmpf oge, %67, %68 : vector<8x512xf32>
    %cst_20 = arith.constant 2.000000e-01 : f32
    %70 = vector.broadcast %cst_20 : f32 to vector<8x512xf32>
    %71 = arith.mulf %70, %67 : vector<8x512xf32>
    %72 = arith.select %69, %67, %71 : vector<8x512xi1>, vector<8x512xf32>
    %c16 = arith.constant 16 : index
    %c0_21 = arith.constant 0 : index
    %73 = vector.load %arg2[%c16, %c0_21] : memref<80x48xf32, #tpu.memory_space<vmem>>, vector<16x24xf32>
    %c1_i32_22 = arith.constant 1 : i32
    %74 = tpu.dynamic_rotate %72 by %c1_i32_22 dim 1 : vector<8x512xf32>, i32 -> vector<8x512xf32>
    %75 = vector.extract_strided_slice %22 {offsets = [0, 0], sizes = [8, 512], strides = [1, 1]} : vector<16x512xf32> to vector<8x512xf32>
    %76 = arith.mulf %74, %75 : vector<8x512xf32>
    %c511_i32_23 = arith.constant 511 : i32
    %77 = tpu.dynamic_rotate %72 by %c511_i32_23 dim 1 : vector<8x512xf32>, i32 -> vector<8x512xf32>
    %78 = vector.extract_strided_slice %44 {offsets = [0, 0], sizes = [8, 512], strides = [1, 1]} : vector<16x512xf32> to vector<8x512xf32>
    %79 = arith.mulf %77, %78 : vector<8x512xf32>
    %80 = tpu.concatenate %76, %72, %79 in 0 : vector<8x512xf32>, vector<8x512xf32>, vector<8x512xf32> -> vector<24x512xf32>
    %cst_24 = arith.constant dense<0.000000e+00> : vector<16x512xf32>
    %81 = tpu.matmul %73, %80, %cst_24 {dimension_numbers = #tpu.dot_dimension_numbers<[1], [0], [0], [1], [0, 0, 1, 1], [], []>} : vector<16x24xf32>, vector<24x512xf32>, vector<16x512xf32> -> vector<16x512xf32>
    %cst_25 = arith.constant 0.000000e+00 : f32
    %82 = vector.broadcast %cst_25 : f32 to vector<16x512xf32>
    %83 = arith.cmpf oge, %81, %82 : vector<16x512xf32>
    %cst_26 = arith.constant 2.000000e-01 : f32
    %84 = vector.broadcast %cst_26 : f32 to vector<16x512xf32>
    %85 = arith.mulf %84, %81 : vector<16x512xf32>
    %86 = arith.select %83, %81, %85 : vector<16x512xi1>, vector<16x512xf32>
    %c32 = arith.constant 32 : index
    %c0_27 = arith.constant 0 : index
    %87 = vector.load %arg2[%c32, %c0_27] : memref<80x48xf32, #tpu.memory_space<vmem>>, vector<16x8xf32>
    %cst_28 = arith.constant dense<0.000000e+00> : vector<16x512xf32>
    %88 = tpu.matmul %87, %58, %cst_28 {dimension_numbers = #tpu.dot_dimension_numbers<[1], [0], [0], [1], [0, 0, 1, 1], [], []>} : vector<16x8xf32>, vector<8x512xf32>, vector<16x512xf32> -> vector<16x512xf32>
    %89 = arith.addf %86, %88 : vector<16x512xf32>
    %c48 = arith.constant 48 : index
    %c0_29 = arith.constant 0 : index
    %90 = vector.load %arg2[%c48, %c0_29] : memref<80x48xf32, #tpu.memory_space<vmem>>, vector<8x48xf32>
    %c1_i32_30 = arith.constant 1 : i32
    %91 = tpu.dynamic_rotate %89 by %c1_i32_30 dim 1 : vector<16x512xf32>, i32 -> vector<16x512xf32>
    %92 = arith.mulf %91, %22 : vector<16x512xf32>
    %c511_i32_31 = arith.constant 511 : i32
    %93 = tpu.dynamic_rotate %89 by %c511_i32_31 dim 1 : vector<16x512xf32>, i32 -> vector<16x512xf32>
    %94 = arith.mulf %93, %44 : vector<16x512xf32>
    %95 = tpu.concatenate %92, %89, %94 in 0 : vector<16x512xf32>, vector<16x512xf32>, vector<16x512xf32> -> vector<48x512xf32>
    %cst_32 = arith.constant dense<0.000000e+00> : vector<8x512xf32>
    %96 = tpu.matmul %90, %95, %cst_32 {dimension_numbers = #tpu.dot_dimension_numbers<[1], [0], [0], [1], [0, 0, 1, 1], [], []>} : vector<8x48xf32>, vector<48x512xf32>, vector<8x512xf32> -> vector<8x512xf32>
    %cst_33 = arith.constant 0.000000e+00 : f32
    %97 = vector.broadcast %cst_33 : f32 to vector<8x512xf32>
    %98 = arith.cmpf oge, %96, %97 : vector<8x512xf32>
    %cst_34 = arith.constant 2.000000e-01 : f32
    %99 = vector.broadcast %cst_34 : f32 to vector<8x512xf32>
    %100 = arith.mulf %99, %96 : vector<8x512xf32>
    %101 = arith.select %98, %96, %100 : vector<8x512xi1>, vector<8x512xf32>
    %c56 = arith.constant 56 : index
    %c0_35 = arith.constant 0 : index
    %102 = vector.load %arg2[%c56, %c0_35] : memref<80x48xf32, #tpu.memory_space<vmem>>, vector<8x24xf32>
    %c1_i32_36 = arith.constant 1 : i32
    %103 = tpu.dynamic_rotate %101 by %c1_i32_36 dim 1 : vector<8x512xf32>, i32 -> vector<8x512xf32>
    %104 = vector.extract_strided_slice %22 {offsets = [0, 0], sizes = [8, 512], strides = [1, 1]} : vector<16x512xf32> to vector<8x512xf32>
    %105 = arith.mulf %103, %104 : vector<8x512xf32>
    %c511_i32_37 = arith.constant 511 : i32
    %106 = tpu.dynamic_rotate %101 by %c511_i32_37 dim 1 : vector<8x512xf32>, i32 -> vector<8x512xf32>
    %107 = vector.extract_strided_slice %44 {offsets = [0, 0], sizes = [8, 512], strides = [1, 1]} : vector<16x512xf32> to vector<8x512xf32>
    %108 = arith.mulf %106, %107 : vector<8x512xf32>
    %109 = tpu.concatenate %105, %101, %108 in 0 : vector<8x512xf32>, vector<8x512xf32>, vector<8x512xf32> -> vector<24x512xf32>
    %cst_38 = arith.constant dense<0.000000e+00> : vector<8x512xf32>
    %110 = tpu.matmul %102, %109, %cst_38 {dimension_numbers = #tpu.dot_dimension_numbers<[1], [0], [0], [1], [0, 0, 1, 1], [], []>} : vector<8x24xf32>, vector<24x512xf32>, vector<8x512xf32> -> vector<8x512xf32>
    %cst_39 = arith.constant 0.000000e+00 : f32
    %111 = vector.broadcast %cst_39 : f32 to vector<8x512xf32>
    %112 = arith.cmpf oge, %110, %111 : vector<8x512xf32>
    %cst_40 = arith.constant 2.000000e-01 : f32
    %113 = vector.broadcast %cst_40 : f32 to vector<8x512xf32>
    %114 = arith.mulf %113, %110 : vector<8x512xf32>
    %115 = arith.select %112, %110, %114 : vector<8x512xi1>, vector<8x512xf32>
    %c64 = arith.constant 64 : index
    %c0_41 = arith.constant 0 : index
    %116 = vector.load %arg2[%c64, %c0_41] : memref<80x48xf32, #tpu.memory_space<vmem>>, vector<8x16xf32>
    %cst_42 = arith.constant dense<0.000000e+00> : vector<8x512xf32>
    %117 = tpu.matmul %116, %89, %cst_42 {dimension_numbers = #tpu.dot_dimension_numbers<[1], [0], [0], [1], [0, 0, 1, 1], [], []>} : vector<8x16xf32>, vector<16x512xf32>, vector<8x512xf32> -> vector<8x512xf32>
    %118 = arith.addf %115, %117 : vector<8x512xf32>
    %c72 = arith.constant 72 : index
    %c0_43 = arith.constant 0 : index
    %119 = vector.load %arg2[%c72, %c0_43] : memref<80x48xf32, #tpu.memory_space<vmem>>, vector<8x8xf32>
    %cst_44 = arith.constant dense<0.000000e+00> : vector<8x512xf32>
    %120 = tpu.matmul %119, %118, %cst_44 {dimension_numbers = #tpu.dot_dimension_numbers<[1], [0], [0], [1], [0, 0, 1, 1], [], []>} : vector<8x8xf32>, vector<8x512xf32>, vector<8x512xf32> -> vector<8x512xf32>
    %121 = vector.extract_strided_slice %120 {offsets = [0, 0], sizes = [2, 512], strides = [1, 1]} : vector<8x512xf32> to vector<2x512xf32>
    %c0_45 = arith.constant 0 : index
    %c0_46 = arith.constant 0 : index
    %122 = vector.load %arg3[%c0_45, %c0_46] : memref<2x512xf32, #tpu.memory_space<vmem>>, vector<2x512xf32>
    tpu.vector_store %arg3[%c0_45, %c0_46], %121 {strides = array<i32>} : memref<2x512xf32, #tpu.memory_space<vmem>>, vector<2x512xf32>,
    return
  }
  func.func @transform_0(%arg0: i32) -> (i32, i32) {
    %c0_i32 = arith.constant 0 : i32
    %c0_i32_0 = arith.constant 0 : i32
    return %c0_i32, %arg0 : i32, i32
  }
  func.func @transform_1(%arg0: i32) -> (i32, i32) {
    %c0_i32 = arith.constant 0 : i32
    %c0_i32_0 = arith.constant 0 : i32
    %c0_i32_1 = arith.constant 0 : i32
    return %c0_i32, %c0_i32_0 : i32, i32
  }
  func.func @transform_2(%arg0: i32) -> (i32, i32) {
    %c0_i32 = arith.constant 0 : i32
    %c0_i32_0 = arith.constant 0 : i32
    return %c0_i32, %arg0 : i32, i32
  }
}

</mosaic_0001>

<bundles_post_ra>
// kernel: tpu_custom_call.1
= control target key start
LH: loop header
LB: loop body
LE: loop exit
PB: predicated region body
PF: predicated region fallthrough
CT: control target
= control target key end

     0   :  { %v12_v0 = vlaneseq  ;;  %v1727_v2 = vmov 1983009808   ;;  %v1728_v4 = vmov 0.0   ;;  %s2072_s0 = inlined_call_operand.vmem [shape: f32[2,512], index: 0, kind: input, shape index: {}]   ;;  %s2073_s1 = inlined_call_operand.vmem [shape: f32[80,48], index: 1, kind: input, shape index: {}]   ;;  %s2074_s2 = inlined_call_operand.hbm [shape: f32[2,512], index: 2, kind: output, shape index: {}]  }
   0x1   :  { %v94_v1 = vld [vmem:[%s2072_s0] sm:$0xff]  ;;  %v98_v3 = vunpack.c.l.s4 %v1727_v2  ;;  %194 = vmatprep.mubr.f32.mxu0 %v1728_v4  ;;  %265 = vmatprep.mubr.f32.mxu1 %v1728_v4 }
   0x2   :  { %7 = vsyncpa [#allocation3], 0  ;;  %v90_v5 = vshrl.u32 %v12_v0, 7  ;;  %v96_v7 = vcombine.high %v94_v1, %v94_v1  ;;  %vm120_vm1 = vcmask 1041408   ;;  %v125_v19 = vld [vmem:[%s2073_s1] sm:$0xff]  ;;  %vm126_vm2 = vcmask 64512  }
   0x3   :  { %v99_v6 = vunpack.c.0.s8 %v98_v3  ;;  %s1729_s12 = smov 1   ;;  %s1730_s13 = smov 127   ;;  %v1788_v32 = vand.u32 127, %v12_v0 }
   0x4   :  { %vm91_vm0 = vcmp.eq.s32.totalorder %v90_v5, 0  ;;  %s1731_s4 = smov [#allocation2]  }
   0x5   :  { %v1620_v8 = vsel %vm91_vm0, 1.0, %v1728_v4  ;;  %v1753_v9 = vsub.s32 %v99_v6, %v90_v5  ;;  %v16_v33 = vadd.s32 384, %v1788_v32  ;;  %v14_v34 = vadd.s32 128, %v1788_v32  ;;  %s1604_s5 = sshll.u32 %s1731_s4, 4  ;;  %s1605_s5 = int_to_ptr.vmem [resolvable:$true] %s1604_s5 }
   0x6   :  { %v118_v10 = vrot.slane %v1620_v8, 6  ;;  %v15_v35 = vadd.s32 256, %v1788_v32  ;;  %vm65_vm7 = vcmp.ne.s32.totalorder %v1788_v32, 0  ;;  %vm293_vm11 = vcmp.lt.s32.totalorder %v1788_v32, 1  ;;  %p1708_p1 = scmp.lt.s32.totalorder %s1605_s5, %s1605_s5 }
   0x7   :  { %v103_v11 = vrot.slane %v94_v1, %v1753_v9  ;;  %v110_v12 = vrot.slane %v96_v7, %v1753_v9  ;;  %v42_v36 = vand.u32 127, %v16_v33  ;;  %v28_v37 = vand.u32 127, %v14_v34 }
   0x8   :  { %v35_v38 = vand.u32 127, %v15_v35  ;;  %v1796_v41 = vsel %vm65_vm7, 1.0, %v1728_v4  ;;  %vm310_vm15 = vcmp.lt.s32.totalorder %v1788_v32, 127  ;;  %vm77_vm0 = vcmp.ne.s32.totalorder %v1788_v32, 127  ;;  %v1278_v32 = vld [vmem:[%s2073_s1 + $0x40] sm:$0xff] }
   0x9   :  { %v111_v13 = vcombine.high %v103_v11, %v103_v11  ;;  %v112_v14 = vcombine.high %v110_v12, %v110_v12  ;;  %v121_v15 = vsel %vm120_vm1, %v103_v11, %v118_v10  ;;  %v123_v16 = vsel %vm120_vm1, %v110_v12, %v118_v10 }
   0xa   :  { %vm68_vm8 = vcmp.ne.s32.totalorder %v42_v36, 0  ;;  %vm66_vm9 = vcmp.ne.s32.totalorder %v28_v37, 0  ;;  %vm67_vm10 = vcmp.ne.s32.totalorder %v35_v38, 0  ;;  %vm80_vm12 = vcmp.ne.s32.totalorder %v42_v36, 127 }
   0xb   :  { %v122_v17 = vsel %vm120_vm1, %v111_v13, %v118_v10  ;;  %v124_v18 = vsel %vm120_vm1, %v112_v14, %v118_v10  ;;  %v1799_v42 = vsel %vm68_vm8, 1.0, %v1728_v4  ;;  %v1802_v43 = vsel %vm66_vm9, 1.0, %v1728_v4  ;;  %v284_v13 = vld [vmem:[%s2073_s1 + $0x8] sm:$0xff] }
   0xc   :  { %130 = vmatprep.subr.mxu0 %v122_v17  ;;  %201 = vmatprep.subr.mxu1 %v124_v18  ;;  %v1805_v44 = vsel %vm67_vm10, 1.0, %v1728_v4  ;;  %vm78_vm13 = vcmp.ne.s32.totalorder %v28_v37, 127  ;;  %vm79_vm14 = vcmp.ne.s32.totalorder %v35_v38, 127  ;;  %v1826_v61 = vsel %vm80_vm12, 1.0, %v1728_v4 }
   0xd   :  { %131 = vmatpush1.msra.mxu0 %v121_v15  ;;  %202 = vmatpush1.msra.mxu1 %v123_v16  ;;  %v1829_v62 = vsel %vm78_vm13, 1.0, %v1728_v4  ;;  %v1832_v63 = vsel %vm79_vm14, 1.0, %v1728_v4  ;;  %v1835_v0 = vsel %vm77_vm0, 1.0, %v1728_v4  ;;  %vm319_vm1 = vcmask 195584  }
   0xe   :  { %1621 = vmatmul.mubr.msk.f32.vlgmr.msra.gmra.mrb[0].mxu0 %vm126_vm2, %v125_v19  ;;  %1622 = vmatmul.mubr.msk.f32.vlgmr.msra.gmra.mrb[0].mxu1 %vm126_vm2, %v125_v19 }
   0xf   :  { %387 = vmatprep.mubr.f32.mxu0 %v1728_v4  ;;  %458 = vmatprep.mubr.f32.mxu1 %v1728_v4 }
  0xe1   :  { %v196_v20 = vpop.f32.mrb[0].mxu0  ;;  %v267_v21 = vpop.f32.mrb[0].mxu1 }
  0xe2   :  { %vm272_vm3 = vcmp.ge.f32.partialorder %v196_v20, 0.0  ;;  %v276_v22 = vmul.f32 0.2, %v196_v20  ;;  %vm274_vm4 = vcmp.ge.f32.partialorder %v267_v21, 0.0  ;;  %v278_v23 = vmul.f32 0.2, %v267_v21 }
  0xe3   :  { %v198_v24 = vpop.f32.mrb[1].mxu0  ;;  %v269_v25 = vpop.f32.mrb[1].mxu1 }
  0xe4   :  { %v277_v26 = vmul.f32 0.2, %v198_v24  ;;  %v279_v27 = vmul.f32 0.2, %v269_v25  ;;  %v1764_v28 = vsel %vm274_vm4, %v267_v21, %v278_v23  ;;  %v1766_v29 = vsel %vm272_vm3, %v196_v20, %v276_v22 }
  0xe5   :  { %vm273_vm5 = vcmp.ge.f32.partialorder %v198_v24, 0.0  ;;  %vm275_vm6 = vcmp.ge.f32.partialorder %v269_v25, 0.0  ;;  %289 = vrot.lane.b32.xlu1 %v1764_v28, %s1729_s12  ;;  %285 = vrot.lane.b32.xlu0 %v1766_v29, %s1729_s12 }
  0xe6   :  { %v1772_v30 = vsel %vm275_vm6, %v269_v25, %v279_v27  ;;  %v1774_v31 = vsel %vm273_vm5, %v198_v24, %v277_v26 }
  0xe9   :  { %291 = vrot.lane.b32.xlu1 %v1772_v30, %s1729_s12  ;;  %287 = vrot.lane.b32.xlu0 %v1774_v31, %s1729_s12 }
  0xed   :  { %304 = vrot.lane.b32.xlu1 %v1774_v31, %s1730_s13  ;;  %302 = vrot.lane.b32.xlu0 %v1766_v29, %s1730_s13 }
  0xf1   :  { %308 = vrot.lane.b32.xlu1 %v1772_v30, %s1730_s13  ;;  %306 = vrot.lane.b32.xlu0 %v1764_v28, %s1730_s13 }
 0x157   :  { %v290_v39 = vpop.permute.xlu1 %289  ;;  %v286_v40 = vpop.permute.xlu0 %285 }
 0x15b   :  { %v292_v45 = vpop.permute.xlu1 %291  ;;  %v288_v46 = vpop.permute.xlu0 %287 }
 0x15c   :  { %v294_v47 = vsel %vm293_vm11, %v290_v39, %v292_v45  ;;  %v297_v48 = vsel %vm293_vm11, %v292_v45, %v286_v40  ;;  %v295_v49 = vsel %vm293_vm11, %v288_v46, %v290_v39  ;;  %v296_v50 = vsel %vm293_vm11, %v286_v40, %v288_v46 }
 0x15d   :  { %v298_v51 = vmul.f32 %v1796_v41, %v297_v48  ;;  %v301_v52 = vmul.f32 %v1799_v42, %v294_v47  ;;  %v299_v53 = vmul.f32 %v1802_v43, %v296_v50  ;;  %v300_v54 = vmul.f32 %v1805_v44, %v295_v49 }
 0x15f   :  { %v1643_v55 = vpack.c.bf16 %v1766_v29, %v298_v51  ;;  %v1647_v56 = vpack.c.bf16 %v1764_v28, %v300_v54  ;;  %v305_v57 = vpop.permute.xlu1 %304  ;;  %v303_v58 = vpop.permute.xlu0 %302  ;;  %v1641_v59 = vpack.c.bf16 %v1774_v31, %v299_v53  ;;  %v1645_v60 = vpack.c.bf16 %v1772_v30, %v301_v52 }
 0x160   :  { %v313_v1 = vsel %vm310_vm15, %v303_v58, %v305_v57 }
 0x161   :  { %1642 = vmatprep.subr.bf16.mxu0 %v1641_v59  ;;  %1646 = vmatprep.subr.bf16.mxu1 %v1645_v60  ;;  %v315_v12 = vmul.f32 %v1835_v0, %v313_v1 }
 0x162   :  { %1644 = vmatpush1.bf16.msra.mxu0 %v1643_v55  ;;  %1648 = vmatpush1.bf16.msra.mxu1 %v1647_v56 }
 0x163   :  { %v309_v2 = vpop.permute.xlu1 %308  ;;  %v307_v3 = vpop.permute.xlu0 %306 }
 0x164   :  { %v314_v5 = vsel %vm310_vm15, %v309_v2, %v303_v58  ;;  %v311_v6 = vsel %vm310_vm15, %v307_v3, %v309_v2  ;;  %v312_v7 = vsel %vm310_vm15, %v305_v57, %v307_v3  ;;  %v477_v3 = vld [vmem:[%s2073_s1 + $0x10] sm:$0xff] }
 0x165   :  { %v318_v8 = vmul.f32 %v1826_v61, %v314_v5  ;;  %v316_v10 = vmul.f32 %v1829_v62, %v312_v7  ;;  %v317_v11 = vmul.f32 %v1832_v63, %v311_v6  ;;  %v478_v5 = vld [vmem:[%s2073_s1 + $0x18] sm:$0xff] }
 0x167   :  { %327 = vmatprep.subr.mxu0 %v316_v10  ;;  %398 = vmatprep.subr.mxu1 %v318_v8 }
 0x168   :  { %328 = vmatpush1.msra.mxu0 %v315_v12  ;;  %399 = vmatpush1.msra.mxu1 %v317_v11 }
 0x169   :  { %1623 = vmatmul.mubr.msk.f32.vlgmr.msra.gmra.mrb[2].mxu0 %vm319_vm1, %v284_v13  ;;  %1624 = vmatmul.mubr.msk.f32.vlgmr.msra.gmra.mrb[2].mxu1 %vm319_vm1, %v284_v13 }
 0x16a   :  { %581 = vmatprep.mubr.f32.mxu0 %v1728_v4  ;;  %658 = vmatprep.mubr.f32.mxu1 %v1728_v4 }
 0x23c   :  { %v389_v14 = vpop.f32.mrb[2].mxu0  ;;  %v460_v15 = vpop.f32.mrb[2].mxu1 }
 0x23d   :  { %vm465_vm3 = vcmp.ge.f32.partialorder %v389_v14, 0.0  ;;  %v469_v16 = vmul.f32 0.2, %v389_v14  ;;  %v391_v17 = vpop.f32.mrb[3].mxu0  ;;  %v462_v18 = vpop.f32.mrb[3].mxu1  ;;  %vm467_vm5 = vcmp.ge.f32.partialorder %v460_v15, 0.0 }
 0x23e   :  { %vm466_vm4 = vcmp.ge.f32.partialorder %v391_v17, 0.0  ;;  %v470_v19 = vmul.f32 0.2, %v391_v17  ;;  %v471_v20 = vmul.f32 0.2, %v460_v15  ;;  %vm468_vm6 = vcmp.ge.f32.partialorder %v462_v18, 0.0 }
 0x23f   :  { %v473_v21 = vsel %vm465_vm3, %v389_v14, %v469_v16  ;;  %v472_v22 = vmul.f32 0.2, %v462_v18  ;;  %vm930_vm3 = vcmask 392192  }
 0x240   :  { %479 = vrot.lane.b32.xlu0 %v473_v21, %s1729_s12  ;;  %v474_v23 = vsel %vm466_vm4, %v391_v17, %v470_v19  ;;  %v475_v24 = vsel %vm467_vm5, %v460_v15, %v471_v20 }
 0x241   :  { %481 = vrot.lane.b32.xlu1 %v474_v23, %s1729_s12  ;;  %v476_v25 = vsel %vm468_vm6, %v462_v18, %v472_v22 }
 0x244   :  { %483 = vrot.lane.b32.xlu0 %v475_v24, %s1729_s12 }
 0x245   :  { %485 = vrot.lane.b32.xlu1 %v476_v25, %s1729_s12 }
 0x248   :  { %495 = vrot.lane.b32.xlu0 %v473_v21, %s1730_s13 }
 0x249   :  { %497 = vrot.lane.b32.xlu1 %v474_v23, %s1730_s13 }
 0x24c   :  { %499 = vrot.lane.b32.xlu0 %v475_v24, %s1730_s13 }
 0x24d   :  { %501 = vrot.lane.b32.xlu1 %v476_v25, %s1730_s13 }
 0x2b2   :  { %v480_v26 = vpop.permute.xlu0 %479 }
 0x2b3   :  { %v482_v27 = vpop.permute.xlu1 %481 }
 0x2b4   :  { %v489_v33 = vsel %vm293_vm11, %v480_v26, %v482_v27 }
 0x2b5   :  { %v492_v34 = vmul.f32 %v1802_v43, %v489_v33 }
 0x2b6   :  { %v484_v35 = vpop.permute.xlu0 %483 }
 0x2b7   :  { %v488_v36 = vsel %vm293_vm11, %v482_v27, %v484_v35  ;;  %v486_v37 = vpop.permute.xlu1 %485  ;;  %v1649_v38 = vpack.c.bf16 %v474_v23, %v492_v34 }
 0x2b8   :  { %v493_v39 = vmul.f32 %v1805_v44, %v488_v36  ;;  %v487_v40 = vsel %vm293_vm11, %v484_v35, %v486_v37  ;;  %v490_v45 = vsel %vm293_vm11, %v486_v37, %v480_v26 }
 0x2b9   :  { %v491_v46 = vmul.f32 %v1796_v41, %v490_v45  ;;  %v494_v47 = vmul.f32 %v1799_v42, %v487_v40  ;;  %1650 = vmatprep.subr.bf16.mxu0 %v1649_v38 }
 0x2ba   :  { %v496_v48 = vpop.permute.xlu0 %495  ;;  %v1655_v52 = vpack.c.bf16 %v475_v24, %v493_v39 }
 0x2bb   :  { %v1651_v49 = vpack.c.bf16 %v473_v21, %v491_v46  ;;  %v498_v50 = vpop.permute.xlu1 %497  ;;  %v1653_v51 = vpack.c.bf16 %v476_v25, %v494_v47 }
 0x2bc   :  { %v505_v53 = vsel %vm310_vm15, %v496_v48, %v498_v50 }
 0x2bd   :  { %1652 = vmatpush1.bf16.msra.mxu0 %v1651_v49  ;;  %1654 = vmatprep.subr.bf16.mxu1 %v1653_v51  ;;  %v507_v60 = vmul.f32 %v1835_v0, %v505_v53 }
 0x2be   :  { %v500_v54 = vpop.permute.xlu0 %499  ;;  %1656 = vmatpush1.bf16.msra.mxu1 %v1655_v52 }
 0x2bf   :  { %v504_v55 = vsel %vm310_vm15, %v498_v50, %v500_v54  ;;  %v502_v56 = vpop.permute.xlu1 %501 }
 0x2c0   :  { %v508_v57 = vmul.f32 %v1829_v62, %v504_v55  ;;  %v503_v58 = vsel %vm310_vm15, %v500_v54, %v502_v56  ;;  %v506_v59 = vsel %vm310_vm15, %v502_v56, %v496_v48 }
 0x2c1   :  { %v509_v1 = vmul.f32 %v1832_v63, %v503_v58  ;;  %v510_v2 = vmul.f32 %v1826_v61, %v506_v59 }
 0x2c2   :  { %521 = vmatprep.subr.mxu0 %v508_v57 }
 0x2c3   :  { %522 = vmatpush1.msra.mxu0 %v507_v60  ;;  %598 = vmatprep.subr.mxu1 %v510_v2 }
 0x2c4   :  { %1625 = vmatmul.mubr.msk.f32.vlgmr.msra.gmra.mrb[4].mxu0 %vm319_vm1, %v477_v3  ;;  %599 = vmatpush1.msra.mxu1 %v509_v1 }
 0x2c5   :  { %703 = vmatprep.subr.mxu0 %v1774_v31  ;;  %1627 = vmatmul.mubr.msk.f32.vlgmr.msra.gmra.mrb[4].mxu1 %vm319_vm1, %v477_v3  ;;  %v695_v31 = vld [vmem:[%s2073_s1 + $0x20] sm:$0xff] }
 0x2c6   :  { %704 = vmatpush1.msra.mxu0 %v1766_v29  ;;  %780 = vmatprep.subr.mxu1 %v1772_v30 }
 0x2c7   :  { %781 = vmatpush1.msra.mxu1 %v1764_v28  ;;  %587 = vmatprep.mubr.f32.mxu0 %v1728_v4  ;;  %v696_v28 = vld [vmem:[%s2073_s1 + $0x28] sm:$0xff] }
 0x2c8   :  { %1626 = vmatmul.mubr.msk.f32.gmra.mrb[6].mxu0 %vm319_vm1, %v478_v5  ;;  %664 = vmatprep.mubr.f32.mxu1 %v1728_v4 }
 0x2c9   :  { %1628 = vmatmul.mubr.msk.f32.gmra.mrb[6].mxu1 %vm319_vm1, %v478_v5  ;;  %767 = vmatprep.mubr.f32.mxu0 %v1728_v4 }
 0x2ca   :  { %844 = vmatprep.mubr.f32.mxu1 %v1728_v4 }
 0x2cc   :  { %1629 = vmatmul.mubr.msk.f32.vlgmr.msra.gmra.mrb[8].mxu0 %vm126_vm2, %v695_v31 }
 0x2cd   :  { %1631 = vmatmul.mubr.msk.f32.vlgmr.msra.gmra.mrb[8].mxu1 %vm126_vm2, %v695_v31  ;;  %773 = vmatprep.mubr.f32.mxu0 %v1728_v4 }
 0x2ce   :  { %850 = vmatprep.mubr.f32.mxu1 %v1728_v4 }
 0x2d0   :  { %1630 = vmatmul.mubr.msk.f32.gmra.mrb[10].mxu0 %vm126_vm2, %v696_v28 }
 0x2d1   :  { %1632 = vmatmul.mubr.msk.f32.gmra.mrb[10].mxu1 %vm126_vm2, %v696_v28  ;;  %998 = vmatprep.mubr.f32.mxu0 %v1728_v4 }
 0x2d2   :  { %1069 = vmatprep.mubr.f32.mxu1 %v1728_v4 }
 0x397   :  { %v583_v29 = vpop.f32.mrb[4].mxu0 }
 0x398   :  { %v585_v30 = vpop.f32.mrb[5].mxu0  ;;  %v660_v6 = vpop.f32.mrb[4].mxu1  ;;  %v679_v7 = vmul.f32 0.2, %v583_v29  ;;  %vm671_vm7 = vcmp.ge.f32.partialorder %v583_v29, 0.0 }
 0x399   :  { %v680_v8 = vmul.f32 0.2, %v585_v30  ;;  %v662_v10 = vpop.f32.mrb[5].mxu1  ;;  %vm672_vm8 = vcmp.ge.f32.partialorder %v585_v30, 0.0  ;;  %v681_v11 = vmul.f32 0.2, %v660_v6 }
 0x39a   :  { %vm673_vm9 = vcmp.ge.f32.partialorder %v660_v6, 0.0  ;;  %v682_v15 = vmul.f32 0.2, %v662_v10  ;;  %vm674_vm10 = vcmp.ge.f32.partialorder %v662_v10, 0.0  ;;  %v687_v17 = vsel %vm671_vm7, %v583_v29, %v679_v7 }
 0x39b   :  { %v589_v12 = vpop.f32.mrb[6].mxu0  ;;  %v688_v18 = vsel %vm672_vm8, %v585_v30, %v680_v8  ;;  %v689_v22 = vsel %vm673_vm9, %v660_v6, %v681_v11 }
 0x39c   :  { %v591_v13 = vpop.f32.mrb[7].mxu0  ;;  %v666_v14 = vpop.f32.mrb[6].mxu1  ;;  %vm675_vm12 = vcmp.ge.f32.partialorder %v589_v12, 0.0  ;;  %v683_v19 = vmul.f32 0.2, %v589_v12  ;;  %v690_v35 = vsel %vm674_vm10, %v662_v10, %v682_v15 }
 0x39d   :  { %v668_v16 = vpop.f32.mrb[7].mxu1  ;;  %v684_v20 = vmul.f32 0.2, %v591_v13  ;;  %vm676_vm13 = vcmp.ge.f32.partialorder %v591_v13, 0.0  ;;  %vm677_vm14 = vcmp.ge.f32.partialorder %v666_v14, 0.0 }
 0x39e   :  { %v685_v23 = vmul.f32 0.2, %v666_v14  ;;  %v686_v27 = vmul.f32 0.2, %v668_v16  ;;  %vm678_vm0 = vcmp.ge.f32.partialorder %v668_v16, 0.0  ;;  %v691_v38 = vsel %vm675_vm12, %v589_v12, %v683_v19 }
 0x39f   :  { %v769_v21 = vpop.f32.mrb[8].mxu0  ;;  %v692_v45 = vsel %vm676_vm13, %v591_v13, %v684_v20 }
 0x3a0   :  { %v857_v24 = vadd.f32 %v769_v21, %v687_v17  ;;  %v771_v25 = vpop.f32.mrb[9].mxu0  ;;  %v846_v26 = vpop.f32.mrb[8].mxu1  ;;  %v693_v47 = vsel %vm677_vm14, %v666_v14, %v685_v23  ;;  %v694_v51 = vsel %vm678_vm0, %v668_v16, %v686_v27 }
 0x3a1   :  { %v858_v33 = vadd.f32 %v771_v25, %v688_v18  ;;  %v859_v34 = vadd.f32 %v846_v26, %v689_v22  ;;  %v848_v36 = vpop.f32.mrb[9].mxu1 }
 0x3a2   :  { %v860_v37 = vadd.f32 %v848_v36, %v690_v35  ;;  %866 = vrot.lane.b32.xlu0 %v857_v24, %s1729_s12 }
 0x3a3   :  { %v775_v39 = vpop.f32.mrb[10].mxu0 }
 0x3a4   :  { %v861_v40 = vadd.f32 %v775_v39, %v691_v38  ;;  %v777_v46 = vpop.f32.mrb[11].mxu0  ;;  %v852_v48 = vpop.f32.mrb[10].mxu1 }
 0x3a5   :  { %v862_v49 = vadd.f32 %v777_v46, %v692_v45  ;;  %v863_v50 = vadd.f32 %v852_v48, %v693_v47  ;;  %v854_v52 = vpop.f32.mrb[11].mxu1 }
 0x3a6   :  { %v1925_v53 = vpack.c.bf16 %v861_v40, %v857_v24  ;;  %v864_v54 = vadd.f32 %v854_v52, %v694_v51  ;;  %868 = vrot.lane.b32.xlu1 %v861_v40, %s1729_s12  ;;  %874 = vrot.lane.b32.xlu0 %v859_v34, %s1729_s12 }
 0x3a7   :  { %v1929_v55 = vpack.c.bf16 %v863_v50, %v859_v34  ;;  %v1931_v56 = vpack.c.bf16 %v862_v49, %v858_v33 }
 0x3a8   :  { %v1933_v57 = vpack.c.bf16 %v864_v54, %v860_v37 }
 0x3aa   :  { %898 = vrot.lane.b32.xlu0 %v857_v24, %s1730_s13  ;;  %876 = vrot.lane.b32.xlu1 %v863_v50, %s1729_s12 }
 0x3ae   :  { %906 = vrot.lane.b32.xlu0 %v859_v34, %s1730_s13  ;;  %900 = vrot.lane.b32.xlu1 %v861_v40, %s1730_s13 }
 0x3b2   :  { %870 = vrot.lane.b32.xlu0 %v858_v33, %s1729_s12  ;;  %908 = vrot.lane.b32.xlu1 %v863_v50, %s1730_s13 }
 0x3b6   :  { %878 = vrot.lane.b32.xlu0 %v860_v37, %s1729_s12  ;;  %872 = vrot.lane.b32.xlu1 %v862_v49, %s1729_s12 }
 0x3ba   :  { %902 = vrot.lane.b32.xlu0 %v858_v33, %s1730_s13  ;;  %880 = vrot.lane.b32.xlu1 %v864_v54, %s1729_s12 }
 0x3be   :  { %910 = vrot.lane.b32.xlu0 %v860_v37, %s1730_s13  ;;  %904 = vrot.lane.b32.xlu1 %v862_v49, %s1730_s13 }
 0x3c2   :  { %912 = vrot.lane.b32.xlu1 %v864_v54, %s1730_s13 }
 0x414   :  { %v867_v58 = vpop.permute.xlu0 %866 }
 0x418   :  { %v875_v59 = vpop.permute.xlu0 %874  ;;  %v869_v60 = vpop.permute.xlu1 %868 }
 0x41c   :  { %v899_v1 = vpop.permute.xlu0 %898  ;;  %v877_v2 = vpop.permute.xlu1 %876 }
 0x420   :  { %v907_v3 = vpop.permute.xlu0 %906  ;;  %v901_v5 = vpop.permute.xlu1 %900 }
 0x424   :  { %v871_v31 = vpop.permute.xlu0 %870  ;;  %v909_v28 = vpop.permute.xlu1 %908 }
 0x425   :  { %v886_v29 = vsel %vm293_vm11, %v867_v58, %v871_v31  ;;  %v884_v17 = vsel %vm293_vm11, %v871_v31, %v875_v59 }
 0x426   :  { %v891_v8 = vmul.f32 %v1802_v43, %v886_v29  ;;  %v892_v26 = vmul.f32 %v1805_v44, %v884_v17 }
 0x428   :  { %v879_v30 = vpop.permute.xlu0 %878  ;;  %v873_v6 = vpop.permute.xlu1 %872 }
 0x429   :  { %v887_v7 = vsel %vm293_vm11, %v869_v60, %v873_v6  ;;  %v888_v10 = vsel %vm293_vm11, %v879_v30, %v867_v58  ;;  %v882_v12 = vsel %vm293_vm11, %v875_v59, %v879_v30  ;;  %v885_v13 = vsel %vm293_vm11, %v873_v6, %v877_v2 }
 0x42a   :  { %v895_v11 = vmul.f32 %v1802_v43, %v887_v7  ;;  %v890_v18 = vmul.f32 %v1796_v41, %v888_v10  ;;  %v893_v21 = vmul.f32 %v1799_v42, %v882_v12  ;;  %v896_v22 = vmul.f32 %v1805_v44, %v885_v13 }
 0x42c   :  { %v903_v14 = vpop.permute.xlu0 %902  ;;  %v881_v15 = vpop.permute.xlu1 %880  ;;  %v1657_v16 = vpack.c.bf16 %v895_v11, %v891_v8  ;;  %v1671_v38 = vpack.c.bf16 %v896_v22, %v892_v26 }
 0x42d   :  { %v883_v19 = vsel %vm293_vm11, %v877_v2, %v881_v15  ;;  %v889_v20 = vsel %vm293_vm11, %v881_v15, %v869_v60  ;;  %v916_v25 = vsel %vm310_vm15, %v903_v14, %v907_v3  ;;  %v918_v39 = vsel %vm310_vm15, %v899_v1, %v903_v14 }
 0x42e   :  { %v894_v23 = vmul.f32 %v1796_v41, %v889_v20  ;;  %v897_v24 = vmul.f32 %v1799_v42, %v883_v19  ;;  %1658 = vmatprep.subr.bf16.mxu0 %v1657_v16  ;;  %v923_v40 = vmul.f32 %v1829_v62, %v916_v25  ;;  %v922_v51 = vmul.f32 %v1835_v0, %v918_v39 }
 0x430   :  { %v1659_v27 = vpack.c.bf16 %v894_v23, %v890_v18  ;;  %v911_v33 = vpop.permute.xlu0 %910  ;;  %v905_v34 = vpop.permute.xlu1 %904  ;;  %v1669_v35 = vpack.c.bf16 %v897_v24, %v893_v21 }
 0x431   :  { %v917_v36 = vsel %vm310_vm15, %v905_v34, %v909_v28  ;;  %v919_v37 = vsel %vm310_vm15, %v901_v5, %v905_v34  ;;  %v914_v46 = vsel %vm310_vm15, %v907_v3, %v911_v33  ;;  %v920_v47 = vsel %vm310_vm15, %v911_v33, %v899_v1 }
 0x432   :  { %v927_v45 = vmul.f32 %v1829_v62, %v917_v36  ;;  %1660 = vmatpush1.bf16.msra.mxu0 %v1659_v27  ;;  %1670 = vmatprep.subr.bf16.mxu1 %v1669_v35  ;;  %v926_v48 = vmul.f32 %v1835_v0, %v919_v37  ;;  %v924_v58 = vmul.f32 %v1832_v63, %v914_v46 }
 0x433   :  { %1662 = vmatprep.subr.bf16.mxu0 %v1931_v56  ;;  %1672 = vmatpush1.bf16.msra.mxu1 %v1671_v38  ;;  %v925_v59 = vmul.f32 %v1826_v61, %v920_v47 }
 0x434   :  { %v913_v49 = vpop.permute.xlu1 %912  ;;  %v1665_v50 = vpack.c.bf16 %v927_v45, %v923_v40  ;;  %1674 = vmatprep.subr.bf16.mxu1 %v1933_v57  ;;  %v1667_v2 = vpack.c.bf16 %v926_v48, %v922_v51 }
 0x435   :  { %v915_v52 = vsel %vm310_vm15, %v909_v28, %v913_v49  ;;  %v921_v54 = vsel %vm310_vm15, %v913_v49, %v901_v5  ;;  %v865_v5 = vld [vmem:[%s2073_s1 + $0x30] sm:$0xff]  ;;  %v1088_v49 = vld [vmem:[%s2073_s1 + $0x38] sm:$0xff] }
 0x436   :  { %v928_v60 = vmul.f32 %v1832_v63, %v915_v52  ;;  %v929_v1 = vmul.f32 %v1826_v61, %v921_v54  ;;  %1664 = vmatpush1.bf16.msra.mxu0 %v1925_v53 }
 0x437   :  { %1666 = vmatprep.subr.bf16.mxu0 %v1665_v50  ;;  %1676 = vmatpush1.bf16.msra.mxu1 %v1929_v55 }
 0x438   :  { %v1679_v3 = vpack.c.bf16 %v928_v60, %v924_v58  ;;  %v1677_v31 = vpack.c.bf16 %v929_v1, %v925_v59 }
 0x43a   :  { %1668 = vmatpush1.bf16.msra.mxu0 %v1667_v2  ;;  %1678 = vmatprep.subr.bf16.mxu1 %v1677_v31 }
 0x43b   :  { %1680 = vmatpush1.bf16.msra.mxu1 %v1679_v3 }
 0x43d   :  { %1633 = vmatmul.mubr.msk.f32.vlgmr.msra.gmra.mrb[12].mxu0 %vm930_vm3, %v865_v5 }
 0x43e   :  { %1188 = vmatprep.mubr.f32.mxu0 %v1728_v4  ;;  %1634 = vmatmul.mubr.msk.f32.vlgmr.msra.gmra.mrb[12].mxu1 %vm930_vm3, %v865_v5  ;;  %v1429_v5 = vld [vmem:[%s2073_s1 + $0x48] sm:$0xff]  ;;  %s1703_s1 = scalar_lea.vmem %s1605_s5, 128 }
 0x43f   :  { %1259 = vmatprep.mubr.f32.mxu1 %v1728_v4  ;;  %p1704_p0 = scmp.ne.s32.totalorder %s1605_s5, %s1703_s1  ;;  %p1709_p2 = scmp.lt.s32.totalorder %s1703_s1, %s1703_s1 }
 0x441   :  { %p1710_p3 = por %p1709_p2, %p1708_p1 }
 0x443   :  { %p1711_p4 = pnand %p1710_p3, %p1704_p0 }
 0x510   :  { %v1000_v28 = vpop.f32.mrb[12].mxu0 }
 0x511   :  { %vm1076_vm4 = vcmp.ge.f32.partialorder %v1000_v28, 0.0  ;;  %v1080_v29 = vmul.f32 0.2, %v1000_v28  ;;  %v1002_v30 = vpop.f32.mrb[13].mxu0  ;;  %v1071_v7 = vpop.f32.mrb[12].mxu1 }
 0x512   :  { %vm1077_vm5 = vcmp.ge.f32.partialorder %v1002_v30, 0.0  ;;  %v1081_v6 = vmul.f32 0.2, %v1002_v30  ;;  %v1082_v8 = vmul.f32 0.2, %v1071_v7  ;;  %v1073_v10 = vpop.f32.mrb[13].mxu1 }
 0x513   :  { %v1084_v11 = vsel %vm1076_vm4, %v1000_v28, %v1080_v29  ;;  %vm1078_vm6 = vcmp.ge.f32.partialorder %v1071_v7, 0.0  ;;  %v1083_v12 = vmul.f32 0.2, %v1073_v10  ;;  %vm1079_vm7 = vcmp.ge.f32.partialorder %v1073_v10, 0.0 }
 0x514   :  { %1089 = vrot.lane.b32.xlu0 %v1084_v11, %s1729_s12  ;;  %v1085_v13 = vsel %vm1077_vm5, %v1002_v30, %v1081_v6  ;;  %v1086_v14 = vsel %vm1078_vm6, %v1071_v7, %v1082_v8 }
 0x515   :  { %1091 = vrot.lane.b32.xlu1 %v1085_v13, %s1729_s12  ;;  %v1087_v15 = vsel %vm1079_vm7, %v1073_v10, %v1083_v12 }
 0x518   :  { %1093 = vrot.lane.b32.xlu0 %v1086_v14, %s1729_s12 }
 0x519   :  { %1095 = vrot.lane.b32.xlu1 %v1087_v15, %s1729_s12 }
 0x51c   :  { %1105 = vrot.lane.b32.xlu0 %v1084_v11, %s1730_s13 }
 0x51d   :  { %1107 = vrot.lane.b32.xlu1 %v1085_v13, %s1730_s13 }
 0x520   :  { %1109 = vrot.lane.b32.xlu0 %v1086_v14, %s1730_s13 }
 0x521   :  { %1111 = vrot.lane.b32.xlu1 %v1087_v15, %s1730_s13 }
 0x586   :  { %v1090_v16 = vpop.permute.xlu0 %1089 }
 0x587   :  { %v1092_v17 = vpop.permute.xlu1 %1091 }
 0x588   :  { %v1099_v18 = vsel %vm293_vm11, %v1090_v16, %v1092_v17 }
 0x589   :  { %v1102_v19 = vmul.f32 %v1802_v43, %v1099_v18 }
 0x58a   :  { %v1094_v20 = vpop.permute.xlu0 %1093 }
 0x58b   :  { %v1098_v21 = vsel %vm293_vm11, %v1092_v17, %v1094_v20  ;;  %v1096_v22 = vpop.permute.xlu1 %1095  ;;  %v1681_v23 = vpack.c.bf16 %v1085_v13, %v1102_v19 }
 0x58c   :  { %v1103_v24 = vmul.f32 %v1805_v44, %v1098_v21  ;;  %v1097_v25 = vsel %vm293_vm11, %v1094_v20, %v1096_v22  ;;  %v1100_v26 = vsel %vm293_vm11, %v1096_v22, %v1090_v16  ;;  %vm1279_vm11 = vcmask 130048  }
 0x58d   :  { %v1101_v27 = vmul.f32 %v1796_v41, %v1100_v26  ;;  %v1104_v33 = vmul.f32 %v1799_v42, %v1097_v25  ;;  %1682 = vmatprep.subr.bf16.mxu0 %v1681_v23 }
 0x58e   :  { %v1106_v43 = vpop.permute.xlu0 %1105  ;;  %v1687_v37 = vpack.c.bf16 %v1086_v14, %v1103_v24 }
 0x58f   :  { %v1683_v34 = vpack.c.bf16 %v1084_v11, %v1101_v27  ;;  %v1108_v35 = vpop.permute.xlu1 %1107  ;;  %v1685_v36 = vpack.c.bf16 %v1087_v15, %v1104_v33 }
 0x590   :  { %v1115_v44 = vsel %vm310_vm15, %v1106_v43, %v1108_v35 }
 0x591   :  { %1684 = vmatpush1.bf16.msra.mxu0 %v1683_v34  ;;  %1686 = vmatprep.subr.bf16.mxu1 %v1685_v36  ;;  %v1117_v46 = vmul.f32 %v1835_v0, %v1115_v44 }
 0x592   :  { %v1110_v38 = vpop.permute.xlu0 %1109  ;;  %1688 = vmatpush1.bf16.msra.mxu1 %v1687_v37 }
 0x593   :  { %v1114_v39 = vsel %vm310_vm15, %v1108_v35, %v1110_v38  ;;  %v1112_v40 = vpop.permute.xlu1 %1111 }
 0x594   :  { %v1118_v41 = vmul.f32 %v1829_v62, %v1114_v39  ;;  %v1113_v42 = vsel %vm310_vm15, %v1110_v38, %v1112_v40  ;;  %v1116_v45 = vsel %vm310_vm15, %v1112_v40, %v1106_v43 }
 0x595   :  { %v1119_v47 = vmul.f32 %v1832_v63, %v1113_v42  ;;  %v1120_v48 = vmul.f32 %v1826_v61, %v1116_v45 }
 0x596   :  { %1128 = vmatprep.subr.mxu0 %v1118_v41 }
 0x597   :  { %1129 = vmatpush1.msra.mxu0 %v1117_v46  ;;  %1199 = vmatprep.subr.mxu1 %v1120_v48 }
 0x598   :  { %1635 = vmatmul.mubr.msk.f32.vlgmr.msra.gmra.mrb[14].mxu0 %vm319_vm1, %v1088_v49  ;;  %1200 = vmatpush1.msra.mxu1 %v1119_v47 }
 0x599   :  { %1690 = vmatprep.subr.bf16.mxu0 %v1931_v56  ;;  %1636 = vmatmul.mubr.msk.f32.vlgmr.msra.gmra.mrb[14].mxu1 %vm319_vm1, %v1088_v49 }
 0x59a   :  { %1692 = vmatpush1.bf16.msra.mxu0 %v1925_v53  ;;  %1694 = vmatprep.subr.bf16.mxu1 %v1933_v57 }
 0x59b   :  { %1696 = vmatpush1.bf16.msra.mxu1 %v1929_v55  ;;  %1347 = vmatprep.mubr.f32.mxu0 %v1728_v4 }
 0x59c   :  { %1418 = vmatprep.mubr.f32.mxu1 %v1728_v4 }
 0x59d   :  { %1637 = vmatmul.mubr.msk.f32.vlgmr.msra.gmra.mrb[16].mxu0 %vm1279_vm11, %v1278_v32 }
 0x59e   :  { %1638 = vmatmul.mubr.msk.f32.vlgmr.msra.gmra.mrb[16].mxu1 %vm1279_vm11, %v1278_v32  ;;  %1497 = vmatprep.mubr.f32.mxu0 %v1728_v4 }
 0x59f   :  { %1568 = vmatprep.mubr.f32.mxu1 %v1728_v4 }
 0x66b   :  { %v1190_v61 = vpop.f32.mrb[14].mxu0 }
 0x66c   :  { %vm1266_vm15 = vcmp.ge.f32.partialorder %v1190_v61, 0.0  ;;  %v1270_v62 = vmul.f32 0.2, %v1190_v61  ;;  %v1192_v63 = vpop.f32.mrb[15].mxu0  ;;  %v1261_v0 = vpop.f32.mrb[14].mxu1 }
 0x66d   :  { %vm1267_vm1 = vcmp.ge.f32.partialorder %v1192_v63, 0.0  ;;  %v1271_v53 = vmul.f32 0.2, %v1192_v63  ;;  %vm1268_vm8 = vcmp.ge.f32.partialorder %v1261_v0, 0.0  ;;  %v1272_v56 = vmul.f32 0.2, %v1261_v0 }
 0x66e   :  { %v1263_v55 = vpop.f32.mrb[15].mxu1  ;;  %v1274_v57 = vsel %vm1266_vm15, %v1190_v61, %v1270_v62 }
 0x66f   :  { %vm1269_vm9 = vcmp.ge.f32.partialorder %v1263_v55, 0.0  ;;  %v1273_v50 = vmul.f32 0.2, %v1263_v55  ;;  %v1275_v51 = vsel %vm1267_vm1, %v1192_v63, %v1271_v53  ;;  %v1276_v52 = vsel %vm1268_vm8, %v1261_v0, %v1272_v56 }
 0x670   :  { %v1349_v54 = vpop.f32.mrb[16].mxu0 }
 0x671   :  { %v1425_v58 = vadd.f32 %v1349_v54, %v1274_v57  ;;  %v1351_v59 = vpop.f32.mrb[17].mxu0  ;;  %v1420_v60 = vpop.f32.mrb[16].mxu1  ;;  %v1277_v4 = vsel %vm1269_vm9, %v1263_v55, %v1273_v50 }
 0x672   :  { %v1426_v1 = vadd.f32 %v1351_v59, %v1275_v51  ;;  %v1427_v2 = vadd.f32 %v1420_v60, %v1276_v52  ;;  %v1422_v3 = vpop.f32.mrb[17].mxu1 }
 0x673   :  { %v1428_v31 = vadd.f32 %v1422_v3, %v1277_v4 }
 0x674   :  { %1433 = vmatprep.subr.mxu0 %v1426_v1 }
 0x675   :  { %1434 = vmatpush1.msra.mxu0 %v1425_v58  ;;  %1504 = vmatprep.subr.mxu1 %v1428_v31 }
 0x676   :  { %1505 = vmatpush1.msra.mxu1 %v1427_v2  ;;  %1639 = vmatmul.mubr.msk.f32.vlgmr.msra.gmra.mrb[18].mxu0 %vm126_vm2, %v1429_v5 }
 0x677   :  { %1640 = vmatmul.mubr.msk.f32.vlgmr.msra.gmra.mrb[18].mxu1 %vm126_vm2, %v1429_v5 }
 0x749   :  { %v1499_v28 = vpop.f32.mrb[18].mxu0 }
 0x74a   :  { %v1570_v29 = vpop.f32.mrb[18].mxu1  ;;  %v1501_v30 = vpop.f32.mrb[19].mxu0 }
 0x74b   :  { %v1579_v6 = vcombine.low %v1499_v28, %v1501_v30  ;;  %v1572_v7 = vpop.f32.mrb[19].mxu1 }
 0x74c   :  { %v1580_v8 = vcombine.low %v1570_v29, %v1572_v7 }
 0x74d   :  { %v1587_v10 = vrot.slane %v1579_v6, %v1753_v9 }
 0x74e   :  { %v1594_v11 = vrot.slane %v1580_v8, %v1753_v9 }
 0x750   :  { %v1595_v12 = vcombine.low %v1587_v10, %v1594_v11 }
 0x752   :  { %1597 = vst [vmem:[#allocation2] sm:$0xff] %v1595_v12 }
 0x753   :  { %1714 = shalt.err (!%p1711_p4)
}
 0x754   :  { %s1715_s8 = scalar_lea.hbm %s2074_s2, 128 }
 0x755   :  { %p1716_p5 = scmp.ne.s32.totalorder %s2074_s2, %s1715_s8  ;;  %p1719_p6 = scmp.lt.u32.totalorder %s1715_s8, %s2074_s2 }
 0x757   :  { %p1721_p7 = pnand %p1719_p6, %p1716_p5 }
 0x759   :  { %1724 = shalt.err (!%p1721_p7)
}
 0x75a   :  { %1607 = dma.vmem_to_hbm [thread:$0]  %s1605_s5, 128, %s2074_s2, [#allocation3]  }
 0x75b   :  { %1725 = dma.done.wait [#allocation3], 128  }
 0x75c   :  { %1726 = vsyncadd [#allocation3], 4294967168 }
 0x75d   :  { %1611 = vsyncpa [#allocation3], 1 }

</bundles_post_ra>
